<compile_context>
chip_gen: v5e
topology: v5e:2x2
jax: 0.10.0
libtpu: 0.0.40
codegen_flags: <defaults>
</compile_context>

<pallas_src>
import math
from functools import partial

import jax
import jax.numpy as jnp
from jax.experimental import pallas as pl
from jax.experimental.pallas import tpu as pltpu


# Dense rows per grid step (each dense row = PACK batch rows). 2048 dense rows
# = 16384 batch rows ~= 2.7 MB of activations per step.
DEFAULT_TILE_ROWS = 2048


def _round_up(n, m):
    return ((n + m - 1) // m) * m


def _pack_factor(input_dim):
    """Batch rows packed per sublane row so pack*input_dim fills 128 lanes."""
    if input_dim <= 128 and 128 % input_dim == 0:
        return 128 // input_dim
    return 1


def _xavier_uniform(key, out_features, in_features, dtype=jnp.float32):
    # Matches torch.nn.init.xavier_uniform_ (gain=1); PyTorch weights are [out, in].
    a = math.sqrt(6.0 / (in_features + out_features))
    return jax.random.uniform(key, (out_features, in_features), dtype=dtype,
                              minval=-a, maxval=a)


def init_realnvp_params(key, input_dim, hidden_dim, conditioning_dim):
    """PyTorch-layout parameters (weights [out, in], biases zero)."""
    half = input_dim // 2
    k1, k2 = jax.random.split(key)
    w1 = _xavier_uniform(k1, hidden_dim, half + conditioning_dim)  # [hidden, half+cond]
    b1 = jnp.zeros((hidden_dim,), jnp.float32)
    w2 = _xavier_uniform(k2, half * 2, hidden_dim)                 # [2*half, hidden]
    b2 = jnp.zeros((half * 2,), jnp.float32)
    return {"w1": w1, "b1": b1, "w2": w2, "b2": b2}


def pack_realnvp_params(params, input_dim):
    """One-time repack into lane-dense, block-diagonal kernel layout."""
    half = input_dim // 2
    w1, b1, w2, b2 = params["w1"], params["b1"], params["w2"], params["b2"]
    hidden = w1.shape[0]
    P = _pack_factor(input_dim)
    f32 = jnp.float32

    # First layer, per-row pieces ([in, out] layout).  x2 rows of w1x are zero,
    # so multiplying the full x row is exactly concat([x1, cond]) @ W1.T.
    w1x = jnp.zeros((input_dim, hidden), f32).at[:half].set(w1[:, :half].T)
    w1c = w1[:, half:].T.astype(f32)                                  # [cond, hidden]

    # Heads placed directly in the OUTPUT lane layout: within each
    # input_dim-wide lane block, the first `half` lanes (x1 pass-through)
    # get zero weight/bias, the last `half` lanes get shift / scale.
    w_shift_out = jnp.zeros((hidden, input_dim), f32).at[:, half:].set(w2[:half].T)
    w_scale_out = jnp.zeros((hidden, input_dim), f32).at[:, half:].set(w2[half:].T)
    b_shift_out = jnp.zeros((input_dim,), f32).at[half:].set(b2[:half])
    b_scale_out = jnp.zeros((input_dim,), f32).at[half:].set(b2[half:])

    # log|det J| folded into the MXU: logdet = h @ w_ld + b_ld.
    w_ld = jnp.sum(w2[half:].T, axis=1, keepdims=True).astype(f32)    # [hidden, 1]
    b_ld = jnp.sum(b2[half:]).astype(f32)

    bd = jax.scipy.linalg.block_diag
    w1x_blk = bd(*([w1x] * P))                                        # [P*D, P*H]
    w1c_blk = bd(*([w1c] * P))                                        # [P*C, P*H]
    b1_blk = jnp.tile(b1.astype(f32), P).reshape(1, -1)               # [1, P*H]

    # Fused shift|scale head: one [P*H, 2*P*D] matmul.
    w_heads_blk = jnp.concatenate(
        [bd(*([w_shift_out] * P)), bd(*([w_scale_out] * P))], axis=1)
    b_heads_blk = jnp.concatenate(
        [jnp.tile(b_shift_out, P), jnp.tile(b_scale_out, P)]).reshape(1, -1)

    w_ld_blk = bd(*([w_ld] * P))                                      # [P*H, P]
    b_ld_blk = jnp.full((1, P), b_ld, f32)

    return {
        "w1x_blk": w1x_blk, "w1c_blk": w1c_blk, "b1_blk": b1_blk,
        "w_heads_blk": w_heads_blk, "b_heads_blk": b_heads_blk,
        "w_ld_blk": w_ld_blk, "b_ld_blk": b_ld_blk,
    }


def _realnvp_kernel(x_ref, c_ref, w1x_ref, w1c_ref, b1_ref,
                    wh_ref, bh_ref, wld_ref, bld_ref,
                    out_ref, ld_ref, *, input_dim):
    """One batch tile (lane-dense layout: `pack` batch rows per sublane row).

    x_ref:   [T, pack*input_dim]     c_ref:  [T, pack*cond_dim]
    w1x_ref: [pack*input_dim, pack*hidden]   w1c_ref: [pack*cond, pack*hidden]
    b1_ref:  [1, pack*hidden]
    wh_ref:  [pack*hidden, 2*pack*input_dim]  (fused shift|scale, output layout)
    bh_ref:  [1, 2*pack*input_dim]
    wld_ref: [pack*hidden, pack]     bld_ref: [1, pack]
    out_ref: [T, pack*input_dim]     ld_ref:  [T, pack]
    """
    half = input_dim // 2
    width = out_ref.shape[-1]                      # pack * input_dim

    x = x_ref[...].astype(jnp.float32)
    c = c_ref[...].astype(jnp.float32)

    # Hidden layer: block-diagonal weights -> exactly concat([x1, cond]) @ W1.T
    # + b1 for every packed batch row (x2 lanes hit zero rows of w1x_blk).
    h = jnp.dot(x, w1x_ref[...], preferred_element_type=jnp.float32)
    h = h + jnp.dot(c, w1c_ref[...], preferred_element_type=jnp.float32)
    h = h + b1_ref[...]
    h = jnp.where(h > 0, h, 0.01 * h)              # LeakyReLU (PyTorch default)

    # Fused shift|scale heads, already in output lane positions (zeros on the
    # x1 pass-through lanes).  128-aligned slices -> no lane relayout.
    heads = jnp.dot(h, wh_ref[...], preferred_element_type=jnp.float32) + bh_ref[...]
    shift_slab = heads[:, :width]
    scale_slab = heads[:, width:]

    # x at z lanes is exactly x2 for that packed row; x1 lanes pass through.
    lane = jax.lax.broadcasted_iota(jnp.int32, x.shape, 1)
    is_x1 = (lane % input_dim) < half
    z = x * jnp.exp(scale_slab) + shift_slab
    out_ref[...] = jnp.where(is_x1, x, z).astype(out_ref.dtype)

    # log|det J| = sum(scale, -1), MXU-folded, one lane per packed batch row.
    ld_ref[...] = (jnp.dot(h, wld_ref[...], preferred_element_type=jnp.float32)
                   + bld_ref[...]).astype(ld_ref.dtype)


def _choose_tile_rows(rows, requested):
    """Pick a dense-row tile: big, multiple of 8, but >= ~4 grid steps when the
    batch allows so v7x's two TensorCores both get work."""
    if rows <= 8:
        return rows                                  # single full block
    tr = min(requested, rows)
    quarter = _round_up(pl.cdiv(rows, 4), 8)
    tr = min(tr, max(8, quarter))
    if tr < rows:
        tr = max(8, (tr // 8) * 8)
    return tr


@partial(jax.jit, static_argnames=("tile_rows",))
def realnvp_forward(x, conditioning, packed, *, tile_rows=DEFAULT_TILE_ROWS):
    """RealNVP.forward: returns (concat([x1, z], -1), log_det_jacobian)."""
    B, D = x.shape
    C = conditioning.shape[-1]
    P = _pack_factor(D)

    # Pad batch to a multiple of the packing factor, then fold P rows per
    # sublane row (row-major reshape: free, no data movement in HBM).
    Bp = _round_up(max(B, 1), P)
    if Bp != B:
        x = jnp.pad(x, ((0, Bp - B), (0, 0)))
        conditioning = jnp.pad(conditioning, ((0, Bp - B), (0, 0)))
    rows = Bp // P
    x_d = x.reshape(rows, P * D)
    c_d = conditioning.reshape(rows, P * C)

    tr = _choose_tile_rows(rows, tile_rows)
    grid = (pl.cdiv(rows, tr),)

    def resident(arr):
        # Same block every grid step -> stays VMEM-resident, DMA'd once.
        return pl.BlockSpec(arr.shape, lambda i: (0, 0))

    # Size the VMEM limit from the actual double-buffered footprint.
    act_bytes = 2 * tr * (2 * P * D + P * C + P) * 4
    wt_bytes = 2 * sum(int(v.size) * v.dtype.itemsize for v in packed.values())
    vmem_limit = int(min(max(act_bytes + wt_bytes + (4 << 20), 16 << 20), 64 << 20))

    out_d, ld_d = pl.pallas_call(
        partial(_realnvp_kernel, input_dim=D),
        grid=grid,
        out_shape=(
            jax.ShapeDtypeStruct((rows, P * D), x.dtype),
            jax.ShapeDtypeStruct((rows, P), jnp.float32),
        ),
        in_specs=[
            pl.BlockSpec((tr, P * D), lambda i: (i, 0)),   # x (lane-dense)
            pl.BlockSpec((tr, P * C), lambda i: (i, 0)),   # conditioning
            resident(packed["w1x_blk"]),
            resident(packed["w1c_blk"]),
            resident(packed["b1_blk"]),
            resident(packed["w_heads_blk"]),
            resident(packed["b_heads_blk"]),
            resident(packed["w_ld_blk"]),
            resident(packed["b_ld_blk"]),
        ],
        out_specs=(
            pl.BlockSpec((tr, P * D), lambda i: (i, 0)),
            pl.BlockSpec((tr, P), lambda i: (i, 0)),
        ),
        compiler_params=pltpu.CompilerParams(
            dimension_semantics=("parallel",),
            vmem_limit_bytes=vmem_limit,
        ),
    )(x_d, c_d,
      packed["w1x_blk"], packed["w1c_blk"], packed["b1_blk"],
      packed["w_heads_blk"], packed["b_heads_blk"],
      packed["w_ld_blk"], packed["b_ld_blk"])

    out = out_d.reshape(Bp, D)[:B]
    logdet = ld_d.reshape(Bp)[:B]
    return out, logdet


def realnvp_reference(x, conditioning, params):
    """Pure-JAX reference matching the PyTorch forward exactly."""
    w1, b1, w2, b2 = params["w1"], params["b1"], params["w2"], params["b2"]
    half = x.shape[-1] // 2
    hi = jax.lax.Precision.HIGHEST
    x1, x2 = x[:, :half], x[:, half:]
    ci = jnp.concatenate([x1, conditioning], axis=-1)
    h = jnp.dot(ci, w1.T, precision=hi) + b1
    h = jnp.where(h > 0, h, 0.01 * h)
    ss = jnp.dot(h, w2.T, precision=hi) + b2
    shift, scale = ss[:, :half], ss[:, half:]
    z = x2 * jnp.exp(scale) + shift
    return jnp.concatenate([x1, z], axis=-1), jnp.sum(scale, axis=-1)


def _check(x, conditioning, params, packed, tile_rows=DEFAULT_TILE_ROWS):
    out, logdet = realnvp_forward(x, conditioning, packed, tile_rows=tile_rows)
    out = jax.block_until_ready(out)
    logdet = jax.block_until_ready(logdet)

    ref_out, ref_logdet = realnvp_reference(x, conditioning, params)
    assert out.shape == x.shape
    assert logdet.shape == (x.shape[0],)
    assert jnp.allclose(out, ref_out, atol=1e-4, rtol=1e-4), "output mismatch"
    # logdet is MXU-folded -> summation order differs slightly from the ref.
    assert jnp.allclose(logdet, ref_logdet, atol=1e-4, rtol=1e-4), "logdet mismatch"


if __name__ == "__main__":
    input_dim = 16
    hidden_dim = 32
    conditioning_dim = 8

    key = jax.random.PRNGKey(0)
    kp, kx, kc, kx2, kc2 = jax.random.split(key, 5)

    params = init_realnvp_params(kp, input_dim, hidden_dim, conditioning_dim)
    packed = pack_realnvp_params(params, input_dim)

    # Small case: batch=4 pads to one packed row, single grid step.
    x = jax.random.normal(kx, (4, input_dim), jnp.float32)
    cond = jax.random.normal(kc, (4, conditioning_dim), jnp.float32)
    _check(x, cond, params, packed)

    # Tiled case: 640 rows -> 80 packed rows -> multi-step pipelined grid
    # (exercises ragged last tile and the multi-core-friendly clamp).
    x2 = jax.random.normal(kx2, (640, input_dim), jnp.float32)
    cond2 = jax.random.normal(kc2, (640, conditioning_dim), jnp.float32)
    _check(x2, cond2, params, packed, tile_rows=32)

    print("KERNEL_OK")
</pallas_src>

<mosaic_0001>
module attributes {stable_mosaic.version = 11 : i64} {
  func.func @_realnvp_kernel(%arg0: i32, %arg1: memref<1x128xf32, #tpu.memory_space<vmem>>, %arg2: memref<1x64xf32, #tpu.memory_space<vmem>>, %arg3: memref<128x256xf32, #tpu.memory_space<vmem>>, %arg4: memref<64x256xf32, #tpu.memory_space<vmem>>, %arg5: memref<1x256xf32, #tpu.memory_space<vmem>>, %arg6: memref<256x256xf32, #tpu.memory_space<vmem>>, %arg7: memref<1x256xf32, #tpu.memory_space<vmem>>, %arg8: memref<256x8xf32, #tpu.memory_space<vmem>>, %arg9: memref<1x8xf32, #tpu.memory_space<vmem>>, %arg10: memref<1x128xf32, #tpu.memory_space<vmem>>, %arg11: memref<1x8xf32, #tpu.memory_space<vmem>>) attributes {dimension_semantics = [#tpu.dimension_semantics<parallel>], iteration_bounds = array<i64: 1>, scalar_prefetch = 0 : i64, scratch_operands = 0 : i64, tpu.core_type = #tpu.core_type<tc>, window_params = [{transform_indices = @transform_0, window_bounds = array<i64: 1, 128>}, {transform_indices = @transform_1, window_bounds = array<i64: 1, 64>}, {pipeline_mode = #tpu.pipeline_mode<synchronous>, transform_indices = @transform_2, window_bounds = array<i64: 128, 256>}, {pipeline_mode = #tpu.pipeline_mode<synchronous>, transform_indices = @transform_3, window_bounds = array<i64: 64, 256>}, {pipeline_mode = #tpu.pipeline_mode<synchronous>, transform_indices = @transform_4, window_bounds = array<i64: 1, 256>}, {pipeline_mode = #tpu.pipeline_mode<synchronous>, transform_indices = @transform_5, window_bounds = array<i64: 256, 256>}, {pipeline_mode = #tpu.pipeline_mode<synchronous>, transform_indices = @transform_6, window_bounds = array<i64: 1, 256>}, {pipeline_mode = #tpu.pipeline_mode<synchronous>, transform_indices = @transform_7, window_bounds = array<i64: 256, 8>}, {pipeline_mode = #tpu.pipeline_mode<synchronous>, transform_indices = @transform_8, window_bounds = array<i64: 1, 8>}, {transform_indices = @transform_9, window_bounds = array<i64: 1, 128>}, {transform_indices = @transform_10, window_bounds = array<i64: 1, 8>}]} {
    %c0 = arith.constant 0 : index
    %c0_0 = arith.constant 0 : index
    %0 = vector.load %arg1[%c0, %c0_0] : memref<1x128xf32, #tpu.memory_space<vmem>>, vector<1x128xf32>
    %c0_1 = arith.constant 0 : index
    %c0_2 = arith.constant 0 : index
    %1 = vector.load %arg2[%c0_1, %c0_2] : memref<1x64xf32, #tpu.memory_space<vmem>>, vector<1x64xf32>
    %c0_3 = arith.constant 0 : index
    %c0_4 = arith.constant 0 : index
    %2 = vector.load %arg3[%c0_3, %c0_4] : memref<128x256xf32, #tpu.memory_space<vmem>>, vector<128x256xf32>
    %cst = arith.constant dense<0.000000e+00> : vector<1x256xf32>
    %3 = tpu.matmul %0, %2, %cst {dimension_numbers = #tpu.dot_dimension_numbers<[1], [0], [0], [1], [0, 0, 1, 1], [], []>} : vector<1x128xf32>, vector<128x256xf32>, vector<1x256xf32> -> vector<1x256xf32>
    %c0_5 = arith.constant 0 : index
    %c0_6 = arith.constant 0 : index
    %4 = vector.load %arg4[%c0_5, %c0_6] : memref<64x256xf32, #tpu.memory_space<vmem>>, vector<64x256xf32>
    %cst_7 = arith.constant dense<0.000000e+00> : vector<1x256xf32>
    %5 = tpu.matmul %1, %4, %cst_7 {dimension_numbers = #tpu.dot_dimension_numbers<[1], [0], [0], [1], [0, 0, 1, 1], [], []>} : vector<1x64xf32>, vector<64x256xf32>, vector<1x256xf32> -> vector<1x256xf32>
    %6 = arith.addf %3, %5 : vector<1x256xf32>
    %c0_8 = arith.constant 0 : index
    %c0_9 = arith.constant 0 : index
    %7 = vector.load %arg5[%c0_8, %c0_9] : memref<1x256xf32, #tpu.memory_space<vmem>>, vector<1x256xf32>
    %8 = arith.addf %6, %7 : vector<1x256xf32>
    %cst_10 = arith.constant 0.000000e+00 : f32
    %9 = vector.broadcast %cst_10 : f32 to vector<1x256xf32>
    %10 = arith.cmpf ogt, %8, %9 : vector<1x256xf32>
    %cst_11 = arith.constant 0.00999999977 : f32
    %11 = vector.broadcast %cst_11 : f32 to vector<1x256xf32>
    %12 = arith.mulf %11, %8 : vector<1x256xf32>
    %13 = arith.select %10, %8, %12 : vector<1x256xi1>, vector<1x256xf32>
    %c0_12 = arith.constant 0 : index
    %c0_13 = arith.constant 0 : index
    %14 = vector.load %arg6[%c0_12, %c0_13] : memref<256x256xf32, #tpu.memory_space<vmem>>, vector<256x256xf32>
    %cst_14 = arith.constant dense<0.000000e+00> : vector<1x256xf32>
    %15 = tpu.matmul %13, %14, %cst_14 {dimension_numbers = #tpu.dot_dimension_numbers<[1], [0], [0], [1], [0, 0, 1, 1], [], []>} : vector<1x256xf32>, vector<256x256xf32>, vector<1x256xf32> -> vector<1x256xf32>
    %c0_15 = arith.constant 0 : index
    %c0_16 = arith.constant 0 : index
    %16 = vector.load %arg7[%c0_15, %c0_16] : memref<1x256xf32, #tpu.memory_space<vmem>>, vector<1x256xf32>
    %17 = arith.addf %15, %16 : vector<1x256xf32>
    %18 = vector.extract_strided_slice %17 {offsets = [0, 0], sizes = [1, 128], strides = [1, 1]} : vector<1x256xf32> to vector<1x128xf32>
    %19 = vector.extract_strided_slice %17 {offsets = [0, 128], sizes = [1, 128], strides = [1, 1]} : vector<1x256xf32> to vector<1x128xf32>
    %20 = tpu.iota {dimensions = array<i32: 1>} : vector<1x128xi32>
    %c16_i32 = arith.constant 16 : i32
    %c0_i32 = arith.constant 0 : i32
    %21 = arith.cmpi eq, %c16_i32, %c0_i32 : i32
    %c1_i32 = arith.constant 1 : i32
    %22 = arith.select %21, %c1_i32, %c16_i32 : i32
    %23 = vector.broadcast %22 : i32 to vector<1x128xi32>
    %24 = arith.remsi %20, %23 : vector<1x128xi32>
    %c0_i32_17 = arith.constant 0 : i32
    %25 = vector.broadcast %c0_i32_17 : i32 to vector<1x128xi32>
    %26 = arith.cmpi ne, %24, %25 : vector<1x128xi32>
    %c0_i32_18 = arith.constant 0 : i32
    %27 = vector.broadcast %c0_i32_18 : i32 to vector<1x128xi32>
    %28 = arith.cmpi slt, %24, %27 : vector<1x128xi32>
    %c0_i32_19 = arith.constant 0 : i32
    %29 = arith.cmpi slt, %22, %c0_i32_19 : i32
    %30 = vector.broadcast %29 : i1 to vector<1x128xi1>
    %31 = vector.broadcast %30 : vector<1x128xi1> to vector<1x128xi1>
    %32 = arith.xori %28, %31 : vector<1x128xi1>
    %33 = arith.andi %32, %26 : vector<1x128xi1>
    %34 = vector.broadcast %22 : i32 to vector<1x128xi32>
    %35 = arith.addi %24, %34 : vector<1x128xi32>
    %36 = arith.select %33, %35, %24 : vector<1x128xi1>, vector<1x128xi32>
    %c8_i32 = arith.constant 8 : i32
    %37 = vector.broadcast %c8_i32 : i32 to vector<1x128xi32>
    %38 = arith.cmpi slt, %36, %37 : vector<1x128xi32>
    %39 = math.exp %19 : vector<1x128xf32>
    %40 = arith.mulf %0, %39 : vector<1x128xf32>
    %41 = arith.addf %40, %18 : vector<1x128xf32>
    %42 = arith.select %38, %0, %41 : vector<1x128xi1>, vector<1x128xf32>
    %c0_20 = arith.constant 0 : index
    %c0_21 = arith.constant 0 : index
    %43 = vector.load %arg10[%c0_20, %c0_21] : memref<1x128xf32, #tpu.memory_space<vmem>>, vector<1x128xf32>
    tpu.vector_store %arg10[%c0_20, %c0_21], %42 {strides = array<i32>} : memref<1x128xf32, #tpu.memory_space<vmem>>, vector<1x128xf32>,
    %c0_22 = arith.constant 0 : index
    %c0_23 = arith.constant 0 : index
    %44 = vector.load %arg8[%c0_22, %c0_23] : memref<256x8xf32, #tpu.memory_space<vmem>>, vector<256x8xf32>
    %cst_24 = arith.constant dense<0.000000e+00> : vector<1x8xf32>
    %45 = tpu.matmul %13, %44, %cst_24 {dimension_numbers = #tpu.dot_dimension_numbers<[1], [0], [0], [1], [0, 0, 1, 1], [], []>} : vector<1x256xf32>, vector<256x8xf32>, vector<1x8xf32> -> vector<1x8xf32>
    %c0_25 = arith.constant 0 : index
    %c0_26 = arith.constant 0 : index
    %46 = vector.load %arg9[%c0_25, %c0_26] : memref<1x8xf32, #tpu.memory_space<vmem>>, vector<1x8xf32>
    %47 = arith.addf %45, %46 : vector<1x8xf32>
    %c0_27 = arith.constant 0 : index
    %c0_28 = arith.constant 0 : index
    %48 = vector.load %arg11[%c0_27, %c0_28] : memref<1x8xf32, #tpu.memory_space<vmem>>, vector<1x8xf32>
    tpu.vector_store %arg11[%c0_27, %c0_28], %47 {strides = array<i32>} : memref<1x8xf32, #tpu.memory_space<vmem>>, vector<1x8xf32>,
    return
  }
  func.func @transform_0(%arg0: i32) -> (i32, i32) {
    %c0_i32 = arith.constant 0 : i32
    %c0_i32_0 = arith.constant 0 : i32
    return %arg0, %c0_i32 : i32, i32
  }
  func.func @transform_1(%arg0: i32) -> (i32, i32) {
    %c0_i32 = arith.constant 0 : i32
    %c0_i32_0 = arith.constant 0 : i32
    return %arg0, %c0_i32 : i32, i32
  }
  func.func @transform_2(%arg0: i32) -> (i32, i32) {
    %c0_i32 = arith.constant 0 : i32
    %c0_i32_0 = arith.constant 0 : i32
    %c0_i32_1 = arith.constant 0 : i32
    return %c0_i32, %c0_i32_0 : i32, i32
  }
  func.func @transform_3(%arg0: i32) -> (i32, i32) {
    %c0_i32 = arith.constant 0 : i32
    %c0_i32_0 = arith.constant 0 : i32
    %c0_i32_1 = arith.constant 0 : i32
    return %c0_i32, %c0_i32_0 : i32, i32
  }
  func.func @transform_4(%arg0: i32) -> (i32, i32) {
    %c0_i32 = arith.constant 0 : i32
    %c0_i32_0 = arith.constant 0 : i32
    %c0_i32_1 = arith.constant 0 : i32
    return %c0_i32, %c0_i32_0 : i32, i32
  }
  func.func @transform_5(%arg0: i32) -> (i32, i32) {
    %c0_i32 = arith.constant 0 : i32
    %c0_i32_0 = arith.constant 0 : i32
    %c0_i32_1 = arith.constant 0 : i32
    return %c0_i32, %c0_i32_0 : i32, i32
  }
  func.func @transform_6(%arg0: i32) -> (i32, i32) {
    %c0_i32 = arith.constant 0 : i32
    %c0_i32_0 = arith.constant 0 : i32
    %c0_i32_1 = arith.constant 0 : i32
    return %c0_i32, %c0_i32_0 : i32, i32
  }
  func.func @transform_7(%arg0: i32) -> (i32, i32) {
    %c0_i32 = arith.constant 0 : i32
    %c0_i32_0 = arith.constant 0 : i32
    %c0_i32_1 = arith.constant 0 : i32
    return %c0_i32, %c0_i32_0 : i32, i32
  }
  func.func @transform_8(%arg0: i32) -> (i32, i32) {
    %c0_i32 = arith.constant 0 : i32
    %c0_i32_0 = arith.constant 0 : i32
    %c0_i32_1 = arith.constant 0 : i32
    return %c0_i32, %c0_i32_0 : i32, i32
  }
  func.func @transform_9(%arg0: i32) -> (i32, i32) {
    %c0_i32 = arith.constant 0 : i32
    %c0_i32_0 = arith.constant 0 : i32
    return %arg0, %c0_i32 : i32, i32
  }
  func.func @transform_10(%arg0: i32) -> (i32, i32) {
    %c0_i32 = arith.constant 0 : i32
    %c0_i32_0 = arith.constant 0 : i32
    return %arg0, %c0_i32 : i32, i32
  }
}

</mosaic_0001>

<bundles_post_ra>
// kernel: realnvp_forward.1
= control target key start
LH: loop header
LB: loop body
LE: loop exit
PB: predicated region body
PF: predicated region fallthrough
CT: control target
= control target key end

     0   :  { %16 = vsyncpa [#allocation3], 0  ;;  %s814_s0 = inlined_call_operand.vmem [shape: f32[1,128], index: 0, kind: input, shape index: {}]   ;;  %s815_s1 = inlined_call_operand.vmem [shape: f32[1,64], index: 1, kind: input, shape index: {}]   ;;  %s816_s2 = inlined_call_operand.vmem [shape: f32[128,256], index: 2, kind: input, shape index: {}]   ;;  %s817_s3 = inlined_call_operand.hbm [shape: f32[64,256], index: 3, kind: input, shape index: {}]   ;;  %s818_s4 = inlined_call_operand.vmem [shape: f32[1,256], index: 4, kind: input, shape index: {}]   ;;  %s819_s5 = inlined_call_operand.hbm [shape: f32[256,256], index: 5, kind: input, shape index: {}]   ;;  %s820_s6 = inlined_call_operand.vmem [shape: f32[1,256], index: 6, kind: input, shape index: {}]   ;;  %s821_s7 = inlined_call_operand.vmem [shape: f32[256,8], index: 7, kind: input, shape index: {}]   ;;  %s822_s8 = inlined_call_operand.vmem [shape: f32[1,8], index: 8, kind: input, shape index: {}]   ;;  %s823_s9 = inlined_call_operand.vmem [shape: f32[1,128], index: 9, kind: output, shape index: {0}]   ;;  %s824_s10 = inlined_call_operand.vmem [shape: f32[1,8], index: 10, kind: output, shape index: {1}]  }
   0x1   :  { %s28_s15 = sshll.u32 %s817_s3, 4  ;;  %s29_s15 = int_to_ptr.hbm [resolvable:$true] %s28_s15 }
   0x2   :  { %17 = vsyncpa [#allocation5], 0  ;;  %s530_s16 = smov [#allocation2]   ;;  %s43_s20 = sshll.u32 %s819_s5, 4  ;;  %s44_s20 = int_to_ptr.hbm [resolvable:$true] %s43_s20 }
   0x3   :  { %s30_s17 = sshll.u32 %s530_s16, 4  ;;  %s531_s21 = smov 256   ;;  %s31_s17 = int_to_ptr.vmem [resolvable:$true] %s30_s17 }
   0x4   :  { %s532_s22 = smov 16   ;;  %s533_s23 = smov [#allocation4]  }
   0x5   :  { %36 = dma.hbm_to_vmem [thread:$0]  %s29_s15, 2048, %s31_s17, [#allocation3], %s531_s21, %s531_s21, %s532_s22  }
   0x6   :  { %s45_s24 = sshll.u32 %s533_s23, 4  ;;  %s46_s24 = int_to_ptr.vmem [resolvable:$true] %s45_s24 }
   0x7   :  { %51 = dma.hbm_to_vmem [thread:$0]  %s44_s20, 8192, %s46_s24, [#allocation5], %s531_s21, %s531_s21, %s532_s22  }
   0x8   :  { %526 = dma.done.wait [#allocation3], 2048  }
   0x9   :  { %527 = vsyncadd [#allocation3], 4294965248 }
   0xa   :  { %528 = dma.done.wait [#allocation5], 8192  }
   0xb   :  { %529 = vsyncadd [#allocation5], 4294959104  ;;  %v98_v0 = vld [vmem:[%s816_s2 + $0xf0] sm:$0xff]  ;;  %v99_v1 = vld [vmem:[%s816_s2 + $0xf8] sm:$0xff]  ;;  %vm116_vm0 = vcmask 523264   ;;  %vm458_vm3 = vcmask 57344  }
   0xc   :  { %v96_v2 = vld [vmem:[%s816_s2 + $0xe0] sm:$0xff]  ;;  %160 = vmatpush.msra.mxu2 %v98_v0  ;;  %180 = vmatpush.msra.mxu3 %v99_v1  ;;  %v97_v3 = vld [vmem:[%s816_s2 + $0xe8] sm:$0xff]  ;;  %v94_v4 = vld [vmem:[%s816_s2 + $0xd0] sm:$0xff] }
   0xd   :  { %v95_v5 = vld [vmem:[%s816_s2 + $0xd8] sm:$0xff]  ;;  %v92_v6 = vld [vmem:[%s816_s2 + $0xc0] sm:$0xff]  ;;  %v93_v7 = vld [vmem:[%s816_s2 + $0xc8] sm:$0xff] }
   0xe   :  { %161 = vmatpush.msra.mxu2 %v96_v2  ;;  %181 = vmatpush.msra.mxu3 %v97_v3  ;;  %v90_v8 = vld [vmem:[%s816_s2 + $0xb0] sm:$0xff]  ;;  %v91_v9 = vld [vmem:[%s816_s2 + $0xb8] sm:$0xff]  ;;  %v88_v12 = vld [vmem:[%s816_s2 + $0xa0] sm:$0xff] }
   0xf   :  { %v114_v10 = vld [vmem:[#allocation2 + $0x70] sm:$0xff]  ;;  %v115_v11 = vld [vmem:[#allocation2 + $0x78] sm:$0xff]  ;;  %v89_v13 = vld [vmem:[%s816_s2 + $0xa8] sm:$0xff] }
  0x10   :  { %162 = vmatpush.msra.mxu2 %v94_v4  ;;  %182 = vmatpush.msra.mxu3 %v95_v5  ;;  %v112_v14 = vld [vmem:[#allocation2 + $0x60] sm:$0xff]  ;;  %v86_v15 = vld [vmem:[%s816_s2 + $0x90] sm:$0xff]  ;;  %v113_v16 = vld [vmem:[#allocation2 + $0x68] sm:$0xff] }
  0x11   :  { %128 = vmatpush.msra.mxu0 %v114_v10  ;;  %148 = vmatpush.msra.mxu1 %v115_v11  ;;  %v87_v17 = vld [vmem:[%s816_s2 + $0x98] sm:$0xff]  ;;  %v110_v18 = vld [vmem:[#allocation2 + $0x50] sm:$0xff]  ;;  %v108_v20 = vld [vmem:[#allocation2 + $0x40] sm:$0xff] }
  0x12   :  { %163 = vmatpush.msra.mxu2 %v92_v6  ;;  %183 = vmatpush.msra.mxu3 %v93_v7  ;;  %v111_v19 = vld [vmem:[#allocation2 + $0x58] sm:$0xff]  ;;  %v109_v21 = vld [vmem:[#allocation2 + $0x48] sm:$0xff]  ;;  %v84_v22 = vld [vmem:[%s816_s2 + $0x80] sm:$0xff] }
  0x13   :  { %129 = vmatpush.msra.mxu0 %v112_v14  ;;  %149 = vmatpush.msra.mxu1 %v113_v16  ;;  %v85_v23 = vld [vmem:[%s816_s2 + $0x88] sm:$0xff]  ;;  %v106_v24 = vld [vmem:[#allocation2 + $0x30] sm:$0xff]  ;;  %v107_v25 = vld [vmem:[#allocation2 + $0x38] sm:$0xff] }
  0x14   :  { %164 = vmatpush.msra.mxu2 %v90_v8  ;;  %184 = vmatpush.msra.mxu3 %v91_v9  ;;  %v82_v26 = vld [vmem:[%s816_s2 + $0x70] sm:$0xff]  ;;  %v83_v27 = vld [vmem:[%s816_s2 + $0x78] sm:$0xff]  ;;  %v104_v28 = vld [vmem:[#allocation2 + $0x20] sm:$0xff] }
  0x15   :  { %130 = vmatpush.msra.mxu0 %v110_v18  ;;  %150 = vmatpush.msra.mxu1 %v111_v19  ;;  %v105_v29 = vld [vmem:[#allocation2 + $0x28] sm:$0xff]  ;;  %v80_v30 = vld [vmem:[%s816_s2 + $0x60] sm:$0xff]  ;;  %v102_v32 = vld [vmem:[#allocation2 + $0x10] sm:$0xff] }
  0x16   :  { %165 = vmatpush.msra.mxu2 %v88_v12  ;;  %185 = vmatpush.msra.mxu3 %v89_v13  ;;  %v81_v31 = vld [vmem:[%s816_s2 + $0x68] sm:$0xff]  ;;  %v103_v33 = vld [vmem:[#allocation2 + $0x18] sm:$0xff]  ;;  %v78_v34 = vld [vmem:[%s816_s2 + $0x50] sm:$0xff] }
  0x17   :  { %131 = vmatpush.msra.mxu0 %v108_v20  ;;  %151 = vmatpush.msra.mxu1 %v109_v21  ;;  %v79_v35 = vld [vmem:[%s816_s2 + $0x58] sm:$0xff]  ;;  %v100_v36 = vld [vmem:[#allocation2] sm:$0xff]  ;;  %v101_v37 = vld [vmem:[#allocation2 + $0x8] sm:$0xff] }
  0x18   :  { %166 = vmatpush.msra.mxu2 %v86_v15  ;;  %186 = vmatpush.msra.mxu3 %v87_v17  ;;  %v76_v38 = vld [vmem:[%s816_s2 + $0x40] sm:$0xff]  ;;  %v77_v39 = vld [vmem:[%s816_s2 + $0x48] sm:$0xff]  ;;  %v74_v41 = vld [vmem:[%s816_s2 + $0x30] sm:$0xff] }
  0x19   :  { %132 = vmatpush.msra.mxu0 %v106_v24  ;;  %152 = vmatpush.msra.mxu1 %v107_v25  ;;  %v67_v40 = vld [vmem:[%s815_s1] sm:$0x1]  ;;  %v75_v42 = vld [vmem:[%s816_s2 + $0x38] sm:$0xff]  ;;  %v244_v43 = vld [vmem:[#allocation4 + $0xf0] sm:$0xff] }
  0x1a   :  { %167 = vmatpush.msra.mxu2 %v84_v22  ;;  %187 = vmatpush.msra.mxu3 %v85_v23  ;;  %v276_v44 = vld [vmem:[#allocation4 + $0x1f0] sm:$0xff]  ;;  %v72_v45 = vld [vmem:[%s816_s2 + $0x20] sm:$0xff]  ;;  %v73_v46 = vld [vmem:[%s816_s2 + $0x28] sm:$0xff] }
  0x1b   :  { %133 = vmatpush.msra.mxu0 %v104_v28  ;;  %153 = vmatpush.msra.mxu1 %v105_v29  ;;  %v242_v47 = vld [vmem:[#allocation4 + $0xe0] sm:$0xff]  ;;  %v70_v49 = vld [vmem:[%s816_s2 + $0x10] sm:$0xff]  ;;  %v71_v50 = vld [vmem:[%s816_s2 + $0x18] sm:$0xff] }
  0x1c   :  { %168 = vmatpush.msra.mxu2 %v82_v26  ;;  %188 = vmatpush.msra.mxu3 %v83_v27  ;;  %v274_v48 = vld [vmem:[#allocation4 + $0x1e0] sm:$0xff]  ;;  %v240_v51 = vld [vmem:[#allocation4 + $0xd0] sm:$0xff]  ;;  %v69_v54 = vld [vmem:[%s816_s2 + $0x8] sm:$0xff] }
  0x1d   :  { %134 = vmatpush.msra.mxu0 %v102_v32  ;;  %154 = vmatpush.msra.mxu1 %v103_v33  ;;  %v272_v52 = vld [vmem:[#allocation4 + $0x1d0] sm:$0xff]  ;;  %v68_v53 = vld [vmem:[%s816_s2] sm:$0xff]  ;;  %v245_v58 = vld [vmem:[#allocation4 + $0xf8] sm:$0xff] }
  0x1e   :  { %169 = vmatpush.msra.mxu2 %v80_v30  ;;  %189 = vmatpush.msra.mxu3 %v81_v31  ;;  %v697_v55 = vld [vmem:[%s814_s0] sm:$0x1]  ;;  %v277_v59 = vld [vmem:[#allocation4 + $0x1f8] sm:$0xff]  ;;  %v236_v60 = vld [vmem:[#allocation4 + $0xb0] sm:$0xff] }
  0x1f   :  { %135 = vmatpush.msra.mxu0 %v100_v36  ;;  %155 = vmatpush.msra.mxu1 %v101_v37  ;;  %v238_v56 = vld [vmem:[#allocation4 + $0xc0] sm:$0xff]  ;;  %v268_v61 = vld [vmem:[#allocation4 + $0x1b0] sm:$0xff]  ;;  %v243_v62 = vld [vmem:[#allocation4 + $0xe8] sm:$0xff] }
  0x20   :  { %170 = vmatpush.msra.mxu2 %v78_v34  ;;  %190 = vmatpush.msra.mxu3 %v79_v35  ;;  %v270_v57 = vld [vmem:[#allocation4 + $0x1c0] sm:$0xff]  ;;  %v275_v63 = vld [vmem:[#allocation4 + $0x1e8] sm:$0xff]  ;;  %v241_v2 = vld [vmem:[#allocation4 + $0xd8] sm:$0xff] }
  0x21   :  { %470 = vmatmul.msk.f32.vlgmr.msra.gmra.mxu0 %vm116_vm0, %v67_v40  ;;  %471 = vmatmul.msk.f32.vlgmr.msra.gmra.mxu1 %vm116_vm0, %v67_v40  ;;  %v234_v0 = vld [vmem:[#allocation4 + $0xa0] sm:$0xff]  ;;  %v273_v3 = vld [vmem:[#allocation4 + $0x1d8] sm:$0xff]  ;;  %v232_v4 = vld [vmem:[#allocation4 + $0x90] sm:$0xff] }
  0x22   :  { %171 = vmatpush.msra.mxu2 %v76_v38  ;;  %191 = vmatpush.msra.mxu3 %v77_v39  ;;  %v266_v1 = vld [vmem:[#allocation4 + $0x1a0] sm:$0xff]  ;;  %v264_v5 = vld [vmem:[#allocation4 + $0x190] sm:$0xff]  ;;  %v239_v6 = vld [vmem:[#allocation4 + $0xc8] sm:$0xff] }
  0x23   :  { %284 = vmatpush.msrb.mxu0 %v244_v43  ;;  %304 = vmatpush.msrb.mxu1 %v276_v44  ;;  %v271_v7 = vld [vmem:[#allocation4 + $0x1c8] sm:$0xff]  ;;  %v230_v8 = vld [vmem:[#allocation4 + $0x80] sm:$0xff]  ;;  %v237_v10 = vld [vmem:[#allocation4 + $0xb8] sm:$0xff] }
  0x24   :  { %172 = vmatpush.msra.mxu2 %v74_v41  ;;  %192 = vmatpush.msra.mxu3 %v75_v42  ;;  %v262_v9 = vld [vmem:[#allocation4 + $0x180] sm:$0xff]  ;;  %v269_v11 = vld [vmem:[#allocation4 + $0x1b8] sm:$0xff]  ;;  %v228_v12 = vld [vmem:[#allocation4 + $0x70] sm:$0xff] }
  0x25   :  { %285 = vmatpush.msrb.mxu0 %v242_v47  ;;  %305 = vmatpush.msrb.mxu1 %v274_v48  ;;  %v260_v13 = vld [vmem:[#allocation4 + $0x170] sm:$0xff]  ;;  %v235_v14 = vld [vmem:[#allocation4 + $0xa8] sm:$0xff]  ;;  %v226_v16 = vld [vmem:[#allocation4 + $0x60] sm:$0xff] }
  0x26   :  { %173 = vmatpush.msra.mxu2 %v72_v45  ;;  %193 = vmatpush.msra.mxu3 %v73_v46  ;;  %v267_v15 = vld [vmem:[#allocation4 + $0x1a8] sm:$0xff]  ;;  %v258_v17 = vld [vmem:[#allocation4 + $0x160] sm:$0xff]  ;;  %v233_v18 = vld [vmem:[#allocation4 + $0x98] sm:$0xff] }
  0x27   :  { %286 = vmatpush.msrb.mxu0 %v240_v51  ;;  %306 = vmatpush.msrb.mxu1 %v272_v52  ;;  %v265_v19 = vld [vmem:[#allocation4 + $0x198] sm:$0xff]  ;;  %v224_v20 = vld [vmem:[#allocation4 + $0x50] sm:$0xff]  ;;  %v231_v22 = vld [vmem:[#allocation4 + $0x88] sm:$0xff] }
  0x28   :  { %174 = vmatpush.msra.mxu2 %v70_v49  ;;  %194 = vmatpush.msra.mxu3 %v71_v50  ;;  %v256_v21 = vld [vmem:[#allocation4 + $0x150] sm:$0xff]  ;;  %v263_v23 = vld [vmem:[#allocation4 + $0x188] sm:$0xff]  ;;  %v222_v24 = vld [vmem:[#allocation4 + $0x40] sm:$0xff] }
  0x29   :  { %287 = vmatpush.msrb.mxu0 %v238_v56  ;;  %307 = vmatpush.msrb.mxu1 %v270_v57  ;;  %v254_v25 = vld [vmem:[#allocation4 + $0x140] sm:$0xff]  ;;  %v229_v26 = vld [vmem:[#allocation4 + $0x78] sm:$0xff]  ;;  %v220_v28 = vld [vmem:[#allocation4 + $0x30] sm:$0xff] }
  0x2a   :  { %175 = vmatpush.msra.mxu2 %v68_v53  ;;  %195 = vmatpush.msra.mxu3 %v69_v54  ;;  %v261_v27 = vld [vmem:[#allocation4 + $0x178] sm:$0xff]  ;;  %v252_v29 = vld [vmem:[#allocation4 + $0x130] sm:$0xff]  ;;  %v227_v30 = vld [vmem:[#allocation4 + $0x68] sm:$0xff] }
  0x2b   :  { %176 = vmatmul.f32.vlgmr.msra.gmra.mxu2 %v697_v55  ;;  %196 = vmatmul.f32.vlgmr.msra.gmra.mxu3 %v697_v55  ;;  %v259_v31 = vld [vmem:[#allocation4 + $0x168] sm:$0xff]  ;;  %v218_v32 = vld [vmem:[#allocation4 + $0x20] sm:$0xff]  ;;  %v225_v34 = vld [vmem:[#allocation4 + $0x58] sm:$0xff] }
  0x2c   :  { %324 = vmatpush.msrb.mxu2 %v245_v58  ;;  %344 = vmatpush.msrb.mxu3 %v277_v59  ;;  %v250_v33 = vld [vmem:[#allocation4 + $0x120] sm:$0xff]  ;;  %v257_v35 = vld [vmem:[#allocation4 + $0x158] sm:$0xff]  ;;  %v216_v36 = vld [vmem:[#allocation4 + $0x10] sm:$0xff] }
  0x2d   :  { %288 = vmatpush.msrb.mxu0 %v236_v60  ;;  %308 = vmatpush.msrb.mxu1 %v268_v61  ;;  %v248_v37 = vld [vmem:[#allocation4 + $0x110] sm:$0xff]  ;;  %v223_v38 = vld [vmem:[#allocation4 + $0x48] sm:$0xff]  ;;  %v214_v40 = vld [vmem:[#allocation4] sm:$0xff] }
  0x2e   :  { %325 = vmatpush.msrb.mxu2 %v243_v62  ;;  %345 = vmatpush.msrb.mxu3 %v275_v63  ;;  %v255_v39 = vld [vmem:[#allocation4 + $0x148] sm:$0xff]  ;;  %v246_v41 = vld [vmem:[#allocation4 + $0x100] sm:$0xff]  ;;  %v400_v42 = vld [vmem:[%s821_s7 + $0x78] sm:$0xff] }
  0x2f   :  { %289 = vmatpush.msrb.mxu0 %v234_v0  ;;  %309 = vmatpush.msrb.mxu1 %v266_v1  ;;  %v416_v43 = vld [vmem:[%s821_s7 + $0xf8] sm:$0xff]  ;;  %v399_v44 = vld [vmem:[%s821_s7 + $0x70] sm:$0xff]  ;;  %v398_v46 = vld [vmem:[%s821_s7 + $0x68] sm:$0xff] }
  0x30   :  { %326 = vmatpush.msrb.mxu2 %v241_v2  ;;  %346 = vmatpush.msrb.mxu3 %v273_v3  ;;  %v415_v45 = vld [vmem:[%s821_s7 + $0xf0] sm:$0xff]  ;;  %v414_v47 = vld [vmem:[%s821_s7 + $0xe8] sm:$0xff]  ;;  %v397_v48 = vld [vmem:[%s821_s7 + $0x60] sm:$0xff] }
  0x31   :  { %290 = vmatpush.msrb.mxu0 %v232_v4  ;;  %310 = vmatpush.msrb.mxu1 %v264_v5  ;;  %v413_v49 = vld [vmem:[%s821_s7 + $0xe0] sm:$0xff]  ;;  %v396_v50 = vld [vmem:[%s821_s7 + $0x58] sm:$0xff]  ;;  %v395_v52 = vld [vmem:[%s821_s7 + $0x50] sm:$0xff] }
  0x32   :  { %327 = vmatpush.msrb.mxu2 %v239_v6  ;;  %347 = vmatpush.msrb.mxu3 %v271_v7  ;;  %v412_v51 = vld [vmem:[%s821_s7 + $0xd8] sm:$0xff]  ;;  %v411_v53 = vld [vmem:[%s821_s7 + $0xd0] sm:$0xff]  ;;  %v394_v54 = vld [vmem:[%s821_s7 + $0x48] sm:$0xff] }
  0x33   :  { %291 = vmatpush.msrb.mxu0 %v230_v8  ;;  %311 = vmatpush.msrb.mxu1 %v262_v9  ;;  %v410_v56 = vld [vmem:[%s821_s7 + $0xc8] sm:$0xff]  ;;  %v393_v57 = vld [vmem:[%s821_s7 + $0x40] sm:$0xff]  ;;  %v221_v59 = vld [vmem:[#allocation4 + $0x38] sm:$0xff] }
  0x34   :  { %328 = vmatpush.msrb.mxu2 %v237_v10  ;;  %348 = vmatpush.msrb.mxu3 %v269_v11  ;;  %v409_v58 = vld [vmem:[%s821_s7 + $0xc0] sm:$0xff]  ;;  %v253_v60 = vld [vmem:[#allocation4 + $0x138] sm:$0xff]  ;;  %v219_v63 = vld [vmem:[#allocation4 + $0x28] sm:$0xff] }
  0x35   :  { %292 = vmatpush.msrb.mxu0 %v228_v12  ;;  %312 = vmatpush.msrb.mxu1 %v260_v13  ;;  %v392_v61 = vld [vmem:[%s821_s7 + $0x38] sm:$0xff]  ;;  %v251_v0 = vld [vmem:[#allocation4 + $0x128] sm:$0xff]  ;;  %v391_v1 = vld [vmem:[%s821_s7 + $0x30] sm:$0xff] }
  0x36   :  { %329 = vmatpush.msrb.mxu2 %v235_v14  ;;  %349 = vmatpush.msrb.mxu3 %v267_v15  ;;  %v408_v62 = vld [vmem:[%s821_s7 + $0xb8] sm:$0xff]  ;;  %v407_v2 = vld [vmem:[%s821_s7 + $0xb0] sm:$0xff]  ;;  %v390_v5 = vld [vmem:[%s821_s7 + $0x28] sm:$0xff] }
  0x37   :  { %293 = vmatpush.msrb.mxu0 %v226_v16  ;;  %313 = vmatpush.msrb.mxu1 %v258_v17  ;;  %v217_v3 = vld [vmem:[#allocation4 + $0x18] sm:$0xff]  ;;  %v406_v6 = vld [vmem:[%s821_s7 + $0xa8] sm:$0xff]  ;;  %v389_v9 = vld [vmem:[%s821_s7 + $0x20] sm:$0xff] }
  0x38   :  { %330 = vmatpush.msrb.mxu2 %v233_v18  ;;  %350 = vmatpush.msrb.mxu3 %v265_v19  ;;  %v249_v4 = vld [vmem:[#allocation4 + $0x118] sm:$0xff]  ;;  %v215_v7 = vld [vmem:[#allocation4 + $0x8] sm:$0xff]  ;;  %v405_v10 = vld [vmem:[%s821_s7 + $0xa0] sm:$0xff] }
  0x39   :  { %294 = vmatpush.msrb.mxu0 %v224_v20  ;;  %314 = vmatpush.msrb.mxu1 %v256_v21  ;;  %v247_v8 = vld [vmem:[#allocation4 + $0x108] sm:$0xff]  ;;  %v388_v11 = vld [vmem:[%s821_s7 + $0x18] sm:$0xff]  ;;  %v387_v13 = vld [vmem:[%s821_s7 + $0x10] sm:$0xff] }
  0x3a   :  { %331 = vmatpush.msrb.mxu2 %v231_v22  ;;  %351 = vmatpush.msrb.mxu3 %v263_v23  ;;  %v404_v12 = vld [vmem:[%s821_s7 + $0x98] sm:$0xff]  ;;  %v403_v14 = vld [vmem:[%s821_s7 + $0x90] sm:$0xff]  ;;  %v386_v15 = vld [vmem:[%s821_s7 + $0x8] sm:$0xff] }
  0x3b   :  { %295 = vmatpush.msrb.mxu0 %v222_v24  ;;  %315 = vmatpush.msrb.mxu1 %v254_v25  ;;  %v402_v16 = vld [vmem:[%s821_s7 + $0x88] sm:$0xff]  ;;  %v385_v17 = vld [vmem:[%s821_s7] sm:$0xff] }
  0x3c   :  { %332 = vmatpush.msrb.mxu2 %v229_v26  ;;  %352 = vmatpush.msrb.mxu3 %v261_v27  ;;  %v401_v18 = vld [vmem:[%s821_s7 + $0x80] sm:$0xff] }
  0x3d   :  { %296 = vmatpush.msrb.mxu0 %v220_v28  ;;  %316 = vmatpush.msrb.mxu1 %v252_v29  ;;  %v200_v19 = vld [vmem:[%s818_s4] sm:$0x3] }
  0x3e   :  { %333 = vmatpush.msrb.mxu2 %v227_v30  ;;  %353 = vmatpush.msrb.mxu3 %v259_v31  ;;  %v202_v22 = vperm.slane %v200_v19, 0  ;;  %v203_v23 = vperm.slane %v200_v19, 1 }
  0x3f   :  { %297 = vmatpush.msrb.mxu0 %v218_v32  ;;  %317 = vmatpush.msrb.mxu1 %v250_v33 }
  0x40   :  { %334 = vmatpush.msrb.mxu2 %v225_v34  ;;  %354 = vmatpush.msrb.mxu3 %v257_v35 }
  0x41   :  { %298 = vmatpush.msrb.mxu0 %v216_v36  ;;  %318 = vmatpush.msrb.mxu1 %v248_v37  ;;  %v278_v36 = vld [vmem:[%s820_s6] sm:$0x3] }
  0x42   :  { %335 = vmatpush.msrb.mxu2 %v223_v38  ;;  %355 = vmatpush.msrb.mxu3 %v255_v39  ;;  %v281_v37 = vperm.slane %v278_v36, 1  ;;  %v417_v38 = vld [vmem:[%s822_s8] sm:$0x1] }
  0x43   :  { %299 = vmatpush.msrb.mxu0 %v214_v40  ;;  %319 = vmatpush.msrb.mxu1 %v246_v41 }
  0x44   :  { %336 = vmatpush.msrb.mxu2 %v221_v59  ;;  %356 = vmatpush.msrb.mxu3 %v253_v60 }
  0x45   :  { %418 = vmatpush.msra.mxu0 %v400_v42  ;;  %438 = vmatpush.msra.mxu1 %v416_v43 }
  0x46   :  { %337 = vmatpush.msrb.mxu2 %v219_v63  ;;  %357 = vmatpush.msrb.mxu3 %v251_v0 }
  0x47   :  { %419 = vmatpush.msra.mxu0 %v399_v44  ;;  %439 = vmatpush.msra.mxu1 %v415_v45  ;;  %v364_v45 = vlaneseq }
  0x48   :  { %338 = vmatpush.msrb.mxu2 %v217_v3  ;;  %358 = vmatpush.msrb.mxu3 %v249_v4 }
  0x49   :  { %420 = vmatpush.msra.mxu0 %v398_v46  ;;  %440 = vmatpush.msra.mxu1 %v414_v47 }
  0x4a   :  { %339 = vmatpush.msrb.mxu2 %v215_v7  ;;  %359 = vmatpush.msrb.mxu3 %v247_v8 }
  0x4b   :  { %421 = vmatpush.msra.mxu0 %v397_v48  ;;  %441 = vmatpush.msra.mxu1 %v413_v49  ;;  %v280_v49 = vperm.slane %v278_v36, 0 }
  0x4d   :  { %422 = vmatpush.msra.mxu0 %v396_v50  ;;  %442 = vmatpush.msra.mxu1 %v412_v51  ;;  %v365_v50 = vand.u32 127, %v364_v45 }
  0x4f   :  { %423 = vmatpush.msra.mxu0 %v395_v52  ;;  %443 = vmatpush.msra.mxu1 %v411_v53  ;;  %v370_v52 = vand.u32 15, %v365_v50 }
  0x51   :  { %424 = vmatpush.msra.mxu0 %v394_v54  ;;  %444 = vmatpush.msra.mxu1 %v410_v56  ;;  %vm378_vm4 = vcmp.lt.s32.totalorder %v370_v52, 8 }
  0x53   :  { %425 = vmatpush.msra.mxu0 %v393_v57  ;;  %445 = vmatpush.msra.mxu1 %v409_v58 }
  0x55   :  { %426 = vmatpush.msra.mxu0 %v392_v61  ;;  %446 = vmatpush.msra.mxu1 %v408_v62 }
  0x57   :  { %427 = vmatpush.msra.mxu0 %v391_v1  ;;  %447 = vmatpush.msra.mxu1 %v407_v2 }
  0x59   :  { %428 = vmatpush.msra.mxu0 %v390_v5  ;;  %448 = vmatpush.msra.mxu1 %v406_v6 }
  0x5b   :  { %429 = vmatpush.msra.mxu0 %v389_v9  ;;  %449 = vmatpush.msra.mxu1 %v405_v10 }
  0x5d   :  { %430 = vmatpush.msra.mxu0 %v388_v11  ;;  %450 = vmatpush.msra.mxu1 %v404_v12 }
  0x5f   :  { %431 = vmatpush.msra.mxu0 %v387_v13  ;;  %451 = vmatpush.msra.mxu1 %v403_v14 }
  0x61   :  { %432 = vmatpush.msra.mxu0 %v386_v15  ;;  %452 = vmatpush.msra.mxu1 %v402_v16 }
  0x63   :  { %433 = vmatpush.msra.mxu0 %v385_v17  ;;  %453 = vmatpush.msra.mxu1 %v401_v18 }
  0x9e   :  { %v137_v20 = vpop.f32.mrf.mxu0  ;;  %v157_v21 = vpop.f32.mrf.mxu1 }
  0xae   :  { %v177_v24 = vpop.f32.mrf.mxu2  ;;  %v197_v25 = vpop.f32.mrf.mxu3 }
  0xaf   :  { %v178_v26 = vadd.f32 %v177_v24, %v137_v20  ;;  %v198_v27 = vadd.f32 %v197_v25, %v157_v21 }
  0xb1   :  { %v206_v28 = vadd.f32 %v202_v22, %v178_v26  ;;  %v207_v29 = vadd.f32 %v203_v23, %v198_v27 }
  0xb3   :  { %vm208_vm1 = vcmp.gt.f32.partialorder %v206_v28, 0.0  ;;  %v210_v30 = vmul.f32 0.01, %v206_v28  ;;  %vm209_vm2 = vcmp.gt.f32.partialorder %v207_v29, 0.0  ;;  %v211_v31 = vmul.f32 0.01, %v207_v29 }
  0xb5   :  { %v212_v32 = vsel %vm208_vm1, %v206_v28, %v210_v30  ;;  %v213_v33 = vsel %vm209_vm2, %v207_v29, %v211_v31 }
  0xb6   :  { %300 = vmatmul.f32.vlgmr.msrb.gmra.mxu0 %v212_v32  ;;  %320 = vmatmul.f32.vlgmr.msrb.gmra.mxu1 %v213_v33 }
  0xb7   :  { %340 = vmatmul.f32.vlgmr.msrb.gmra.mxu2 %v212_v32  ;;  %360 = vmatmul.f32.vlgmr.msrb.gmra.mxu3 %v213_v33 }
  0xbe   :  { %434 = vmatmul.f32.vlgmr.msra.gmra.mxu0 %v212_v32  ;;  %454 = vmatmul.f32.vlgmr.msra.gmra.mxu1 %v213_v33 }
 0x133   :  { %v301_v34 = vpop.f32.mrf.mxu0  ;;  %v321_v35 = vpop.f32.mrf.mxu1 }
 0x134   :  { %v302_v51 = vadd.f32 %v301_v34, %v280_v49 }
 0x136   :  { %v322_v54 = vadd.f32 %v321_v35, %v302_v51 }
 0x13a   :  { %v341_v39 = vpop.f32.mrf.mxu2  ;;  %v361_v42 = vpop.f32.mrf.mxu3 }
 0x13b   :  { %v342_v40 = vadd.f32 %v341_v39, %v281_v37  ;;  %v435_v41 = vpop.f32.mrf.mxu0  ;;  %v455_v46 = vpop.f32.mrf.mxu1 }
 0x13c   :  { %v436_v43 = vadd.f32 %v435_v41, %v417_v38 }
 0x13d   :  { %v362_v44 = vadd.f32 %v361_v42, %v342_v40 }
 0x13e   :  { %v456_v47 = vadd.f32 %v455_v46, %v436_v43 }
 0x13f   :  { %v379_v48 = vmul.f32 1.442695, %v362_v44 }
 0x140   :  { %459 = vst.msk [vmem:[%s824_s10] sm:$0x1] %vm458_vm3, %v456_v47 }
 0x141   :  { %476 = vpow2.f32 %v379_v48 }
 0x147   :  { %v477_v53 = vpop.eup %476 }
 0x148   :  { %v381_v56 = vmul.f32 %v477_v53, %v697_v55 }
 0x14a   :  { %v382_v57 = vadd.f32 %v381_v56, %v322_v54 }
 0x14c   :  { %v383_v58 = vsel %vm378_vm4, %v697_v55, %v382_v57 }
 0x14d   :  { %384 = vst [vmem:[%s823_s9] sm:$0x1] %v383_v58 }
 0x14e   :  { %468 = vsyncpa [#allocation3], 1 }
 0x14f   :  { %469 = vsyncpa [#allocation5], 1 }

</bundles_post_ra>
